<compile_context>
chip_gen: v6e
topology: v6e:2x2x1
jax: 0.10.0
libtpu: 0.0.40
codegen_flags: <defaults>
</compile_context>

<pallas_src>
import functools

import jax
import jax.numpy as jnp
from jax.experimental import pallas as pl
from jax.experimental.pallas import tpu as pltpu


def _round_up(x, m):
    return ((x + m - 1) // m) * m


def _linear_kernel(x_ref, w_ref, b_ref, o_ref, acc_ref, *, apply_relu):
    """One (tm, tn) output tile of y = x @ w + b (+ReLU); K streamed on axis 2."""
    k = pl.program_id(2)

    @pl.when(k == 0)
    def _():
        acc_ref[...] = jnp.zeros_like(acc_ref)

    acc_ref[...] += jnp.dot(
        x_ref[...], w_ref[...], preferred_element_type=jnp.float32
    )

    @pl.when(k == pl.num_programs(2) - 1)
    def _():
        y = acc_ref[...] + b_ref[...]
        if apply_relu:
            y = jnp.maximum(y, 0.0)
        o_ref[...] = y.astype(o_ref.dtype)


def pallas_linear(x, w_t, b, *, apply_relu, out_dtype=None,
                  tm_max=256, tn_max=512, tk_max=512):
    """y = x @ w_t + b (optionally ReLU).  x: (B, K), w_t: (K, N), b: (N,)."""
    B, K = x.shape
    K2, N = w_t.shape
    assert K == K2
    out_dtype = out_dtype if out_dtype is not None else x.dtype

    # Tile sizes: lane-dense (multiples of 128) on N/K, sublane-aligned on M.
    tm = min(tm_max, _round_up(B, 8))
    tn = min(tn_max, _round_up(N, 128))
    tk = min(tk_max, _round_up(K, 128))

    Bp, Kp, Np = _round_up(B, tm), _round_up(K, tk), _round_up(N, tn)

    x_p = x if (Bp, Kp) == (B, K) else jnp.pad(x, ((0, Bp - B), (0, Kp - K)))
    w_p = w_t if (Kp, Np) == (K, N) else jnp.pad(w_t, ((0, Kp - K), (0, Np - N)))
    b_p = b if Np == N else jnp.pad(b, (0, Np - N))
    b2d = b_p.reshape(1, Np).astype(jnp.float32)

    grid = (Bp // tm, Np // tn, Kp // tk)
    kernel = functools.partial(_linear_kernel, apply_relu=apply_relu)

    out_itemsize = jnp.dtype(out_dtype).itemsize
    cost = pl.CostEstimate(
        flops=2 * Bp * Kp * Np,
        transcendentals=0,
        bytes_accessed=(x_p.size * x_p.dtype.itemsize
                        + w_p.size * w_p.dtype.itemsize
                        + Np * 4
                        + Bp * Np * out_itemsize),
    )

    out = pl.pallas_call(
        kernel,
        out_shape=jax.ShapeDtypeStruct((Bp, Np), out_dtype),
        grid_spec=pltpu.PrefetchScalarGridSpec(
            num_scalar_prefetch=0,
            grid=grid,
            in_specs=[
                pl.BlockSpec((tm, tk), lambda i, j, k: (i, k)),   # activations
                pl.BlockSpec((tk, tn), lambda i, j, k: (k, j)),   # weights
                pl.BlockSpec((1, tn), lambda i, j, k: (0, j)),    # bias tile
            ],
            out_specs=pl.BlockSpec((tm, tn), lambda i, j, k: (i, j)),
            scratch_shapes=[pltpu.VMEM((tm, tn), jnp.float32)],
        ),
        compiler_params=pltpu.CompilerParams(
            dimension_semantics=("parallel", "parallel", "arbitrary"),
            vmem_limit_bytes=64 * 1024 * 1024,
        ),
        cost_estimate=cost,
    )(x_p, w_p, b2d)

    if (Bp, Np) != (B, N):
        out = out[:B, :N]
    return out


def init_dnn_params(key, n_class=10, num_layers=6, width=2048):
    """Deterministic init matching DNN._initialize_weights shapes/statistics.

    Weights are stored transposed (in, out) and cast to bf16 once here so the
    kernel's hot path is a bf16 MXU matmul; biases stay f32 (f32 accumulator).
    """
    width_list = [32 * 32 * 3] + [width] * (num_layers - 1)
    dims = list(zip(width_list[:-1], width_list[1:])) + [(width_list[-1], n_class)]
    params = []
    for fan_in, fan_out in dims:
        key, kw, kb = jax.random.split(key, 3)
        std = (2.0 / fan_in) ** 0.5
        w_t = (std * jax.random.normal(kw, (fan_in, fan_out), dtype=jnp.float32)
               ).astype(jnp.bfloat16)
        b = (0.1 ** 0.5) * jax.random.normal(kb, (fan_out,), dtype=jnp.float32)
        params.append((w_t, b))
    return params


def dnn_forward(x, params):
    """x: (B, 3, 32, 32) NCHW -> logits (B, n_class) in f32."""
    B = x.shape[0]
    h = x.reshape(B, -1).astype(jnp.bfloat16)  # flatten(1), bf16 activations
    # Pad the batch once to a sublane multiple; keep it padded across layers.
    Bp = _round_up(B, 8)
    if Bp != B:
        h = jnp.pad(h, ((0, Bp - B), (0, 0)))
    n = len(params)
    for i, (w_t, b) in enumerate(params):
        last = i == n - 1
        h = pallas_linear(
            h, w_t, b,
            apply_relu=not last,
            out_dtype=jnp.float32 if last else jnp.bfloat16,
        )
    return h[:B]


if __name__ == "__main__":
    key = jax.random.PRNGKey(0)
    # Small configuration consistent with the module's forward:
    # input must be (B, 3, 32, 32) because the first Linear has in_features=3072.
    n_class, num_layers, width = 10, 3, 256
    kx, kp = jax.random.split(key)
    x = jax.random.normal(kx, (2, 3, 32, 32), dtype=jnp.float32)
    params = init_dnn_params(kp, n_class=n_class, num_layers=num_layers, width=width)

    out = dnn_forward(x, params)
    jax.block_until_ready(out)

    # Plain-JAX reference of the same math (same bf16 quantization points,
    # f32 accumulation), so only MXU accumulation-order differences remain.
    h = x.reshape(x.shape[0], -1).astype(jnp.bfloat16)
    for i, (w_t, b) in enumerate(params):
        y = h.astype(jnp.float32) @ w_t.astype(jnp.float32) + b
        if i < len(params) - 1:
            y = jnp.maximum(y, 0.0)
            h = y.astype(jnp.bfloat16)
        else:
            h = y
    assert out.shape == (2, n_class)
    assert out.dtype == jnp.float32
    assert jnp.allclose(out, h, atol=1e-2, rtol=1e-2)

    print("KERNEL_OK")
</pallas_src>

<mosaic_0001>
module attributes {stable_mosaic.version = 11 : i64} {
  func.func @_linear_kernel(%arg0: i32, %arg1: i32, %arg2: i32, %arg3: memref<8x512xbf16, #tpu.memory_space<vmem>>, %arg4: memref<512x256xbf16, #tpu.memory_space<vmem>>, %arg5: memref<1x256xf32, #tpu.memory_space<vmem>>, %arg6: memref<8x256xbf16, #tpu.memory_space<vmem>>, %arg7: memref<8x256xf32, #tpu.memory_space<vmem>>) attributes {dimension_semantics = [#tpu.dimension_semantics<parallel>, #tpu.dimension_semantics<parallel>, #tpu.dimension_semantics<arbitrary>], iteration_bounds = array<i64: 1, 1, 6>, scalar_prefetch = 0 : i64, scratch_operands = 1 : i64, tpu.core_type = #tpu.core_type<tc>, window_params = [{transform_indices = @transform_0, window_bounds = array<i64: 8, 512>}, {transform_indices = @transform_1, window_bounds = array<i64: 512, 256>}, {transform_indices = @transform_2, window_bounds = array<i64: 1, 256>}, {transform_indices = @transform_3, window_bounds = array<i64: 8, 256>}]} {
    %c0_i32 = arith.constant 0 : i32
    %0 = arith.cmpi eq, %arg2, %c0_i32 : i32
    %1 = arith.extui %0 : i1 to i32
    %c0_i32_0 = arith.constant 0 : i32
    %2 = arith.cmpi ne, %1, %c0_i32_0 : i32
    scf.if %2 {
      %cst_9 = arith.constant 0.000000e+00 : f32
      %12 = vector.broadcast %cst_9 : f32 to vector<8x256xf32>
      %c0_10 = arith.constant 0 : index
      %c0_11 = arith.constant 0 : index
      %13 = vector.load %arg7[%c0_10, %c0_11] : memref<8x256xf32, #tpu.memory_space<vmem>>, vector<8x256xf32>
      tpu.vector_store %arg7[%c0_10, %c0_11], %12 {strides = array<i32>} : memref<8x256xf32, #tpu.memory_space<vmem>>, vector<8x256xf32>,
    } else {
    }
    %c0 = arith.constant 0 : index
    %c0_1 = arith.constant 0 : index
    %3 = vector.load %arg7[%c0, %c0_1] : memref<8x256xf32, #tpu.memory_space<vmem>>, vector<8x256xf32>
    %c0_2 = arith.constant 0 : index
    %c0_3 = arith.constant 0 : index
    %4 = vector.load %arg3[%c0_2, %c0_3] : memref<8x512xbf16, #tpu.memory_space<vmem>>, vector<8x512xbf16>
    %c0_4 = arith.constant 0 : index
    %c0_5 = arith.constant 0 : index
    %5 = vector.load %arg4[%c0_4, %c0_5] : memref<512x256xbf16, #tpu.memory_space<vmem>>, vector<512x256xbf16>
    %cst = arith.constant dense<0.000000e+00> : vector<8x256xf32>
    %6 = tpu.matmul %4, %5, %cst {dimension_numbers = #tpu.dot_dimension_numbers<[1], [0], [0], [1], [0, 0, 1, 1], [], []>} : vector<8x512xbf16>, vector<512x256xbf16>, vector<8x256xf32> -> vector<8x256xf32>
    %7 = arith.addf %3, %6 : vector<8x256xf32>
    %c0_6 = arith.constant 0 : index
    %c0_7 = arith.constant 0 : index
    %8 = vector.load %arg7[%c0_6, %c0_7] : memref<8x256xf32, #tpu.memory_space<vmem>>, vector<8x256xf32>
    tpu.vector_store %arg7[%c0_6, %c0_7], %7 {strides = array<i32>} : memref<8x256xf32, #tpu.memory_space<vmem>>, vector<8x256xf32>,
    %c5_i32 = arith.constant 5 : i32
    %9 = arith.cmpi eq, %arg2, %c5_i32 : i32
    %10 = arith.extui %9 : i1 to i32
    %c0_i32_8 = arith.constant 0 : i32
    %11 = arith.cmpi ne, %10, %c0_i32_8 : i32
    scf.if %11 {
      %c0_9 = arith.constant 0 : index
      %c0_10 = arith.constant 0 : index
      %12 = vector.load %arg7[%c0_9, %c0_10] : memref<8x256xf32, #tpu.memory_space<vmem>>, vector<8x256xf32>
      %c0_11 = arith.constant 0 : index
      %c0_12 = arith.constant 0 : index
      %13 = vector.load %arg5[%c0_11, %c0_12] : memref<1x256xf32, #tpu.memory_space<vmem>>, vector<1x256xf32>
      %14 = vector.broadcast %13 : vector<1x256xf32> to vector<8x256xf32>
      %15 = arith.addf %12, %14 : vector<8x256xf32>
      %cst_13 = arith.constant 0.000000e+00 : f32
      %16 = vector.broadcast %cst_13 : f32 to vector<8x256xf32>
      %17 = arith.maximumf %15, %16 : vector<8x256xf32>
      %18 = arith.truncf %17 : vector<8x256xf32> to vector<8x256xbf16>
      %c0_14 = arith.constant 0 : index
      %c0_15 = arith.constant 0 : index
      %19 = vector.load %arg6[%c0_14, %c0_15] : memref<8x256xbf16, #tpu.memory_space<vmem>>, vector<8x256xbf16>
      tpu.vector_store %arg6[%c0_14, %c0_15], %18 {strides = array<i32>} : memref<8x256xbf16, #tpu.memory_space<vmem>>, vector<8x256xbf16>,
    } else {
    }
    return
  }
  func.func @transform_0(%arg0: i32, %arg1: i32, %arg2: i32) -> (i32, i32) {
    %c0_i32 = arith.constant 0 : i32
    return %arg0, %arg2 : i32, i32
  }
  func.func @transform_1(%arg0: i32, %arg1: i32, %arg2: i32) -> (i32, i32) {
    %c0_i32 = arith.constant 0 : i32
    return %arg2, %arg1 : i32, i32
  }
  func.func @transform_2(%arg0: i32, %arg1: i32, %arg2: i32) -> (i32, i32) {
    %c0_i32 = arith.constant 0 : i32
    %c0_i32_0 = arith.constant 0 : i32
    return %c0_i32, %arg1 : i32, i32
  }
  func.func @transform_3(%arg0: i32, %arg1: i32, %arg2: i32) -> (i32, i32) {
    %c0_i32 = arith.constant 0 : i32
    return %arg0, %arg1 : i32, i32
  }
}

</mosaic_0001>

<bundles_post_ra>
// kernel: tpu_custom_call.1
= control target key start
LH: loop header
LB: loop body
LE: loop exit
PB: predicated region body
PF: predicated region fallthrough
CT: control target
= control target key end

     0   :  { %8 = vsyncpa [#allocation4], 0  ;;  %s1632_s0 = inlined_call_operand.hbm [shape: bf16[8,3072], index: 0, kind: input, shape index: {}]   ;;  %s1633_s1 = inlined_call_operand.hbm [shape: bf16[3072,256], index: 1, kind: input, shape index: {}]   ;;  %s1634_s2 = inlined_call_operand.hbm [shape: f32[1,256], index: 2, kind: input, shape index: {}]   ;;  %s1635_s3 = inlined_call_operand.hbm [shape: bf16[8,256], index: 3, kind: output, shape index: {}]  }
   0x1   :  { %10 = vsyncpa [#allocation4 + $0x1], 0 }
   0x2   :  { %11 = vsyncpa [#allocation7], 0 }
   0x3   :  { %13 = vsyncpa [#allocation7 + $0x1], 0 }
   0x4   :  { %14 = vsyncpa [#allocation5], 0  ;;  %s1391_s12 = smov 0   ;;  %s1393_s13 = smov 0  }
   0x5   :  { %s1395_s14 = smov 0   ;;  %s1397_s15 = smov 0  }
   0x6   :  { %s1399_s16 = smov 0   ;;  %s1401_s17 = smov 0  }
   0x7 LB: > { %s1420_s18 = sadd.s32 4294967295, %s1362_s17   ;;  %s48_s19 = sadd.s32 1, %s1350_s14  ;;  %s1362_s17 = sphi %s1401_s17, %s20_s17   ;;  %s1358_s16 = sphi %s1399_s16, %s1653_s16   ;;  %s1354_s15 = sphi %s1397_s15, %s1652_s15   ;;  %s1350_s14 = sphi %s1395_s14, %s1651_s14   ;;  %s1346_s13 = sphi %s1393_s13, %s1650_s13   ;;  %s1342_s12 = sphi %s1391_s12, %s1649_s12  }
   0x8   : > { %p55_p0 = scmp.ne.s32.totalorder %s1350_s14, %s1346_s13  ;;  %p61_p1 = scmp.ne.s32.totalorder %s1346_s13, %s1342_s12 }
   0x9   : > { %p1636_p2 = scmp.eq.s32.totalorder %s1420_s18, 0  ;;  %p920_p3 = scmp.ge.s32.totalorder %s1362_s17, 1 }
   0xa   : > { %p154_p4 = scmp.lt.s32.totalorder %s1362_s17, 7  ;;  %s1364_s22 = smov [#allocation8]  }
   0xb   : > { %p1431_p5 = por %p1636_p2, %p61_p1  ;;  %s170_s23 = sshll.u32 %s1364_s22, 4  ;;  %s171_s23 = int_to_ptr.vmem [resolvable:$true] %s170_s23 }
   0xc   : > { %p1435_p6 = pnand %p920_p3, %p154_p4  ;;  %p56_p8 = scmp.eq.s32.totalorder %s1362_s17, 0 }
   0xd   : > { %s1639_s20 = scalar_select %p1431_p5, 1, 0 }
   0xe   : > { %s1640_s21 = scalar_select %p1435_p6, 1, 0 }
   0xf   : > { %p1025_p7 = pneg %p1435_p6  ;;  %s32_s25 = sadd.s32 1, %s1358_s16 }
  0x10   : > { %p1449_p10 = scmp.ge.s32.totalorder %s32_s25, 6  ;;  %p1456_p11 = por %p56_p8, %p55_p0 }
  0x11   : > { %p1444_p9 = pnand %p1025_p7, %p1636_p2  ;;  %p1037_p12 = scmp.lt.s32.totalorder %s1362_s17, 6 }
  0x12   : > { %s1205_s28 = scalar_lea.vmem %s171_s23, 32  ;;  %p1213_p7 = scmp.lt.s32.totalorder %s171_s23, %s171_s23 }
  0x13   : > { %p1196_p13 = pneg %p1444_p9  ;;  %p1206_p1 = scmp.ne.s32.totalorder %s171_s23, %s1205_s28 }
  0x14   : > { %p1214_p2 = scmp.lt.s32.totalorder %s1205_s28, %s1205_s28 }
  0x15   : > { %p1208_p3 = pnand %p1206_p1, %p1196_p13 }
  0x16   : > { %p1215_p5 = por %p1214_p2, %p1213_p7 }
  0x17   : > { %p1209_p4 = pneg %p1208_p3 }
  0x19   : > { %p1216_p6 = pnand %p1215_p5, %p1209_p4 }
  0x1b   : > { %1219 = shalt.err (!%p1216_p6)
}
  0x1c   : > { %1028 = dma.hbm_to_vmem [thread:$0]  (!%p1444_p9), %s1634_s2, 32, %s171_s23, [#allocation7]  }
  0x1d   : > { %s1655_s25 = smov (%p1449_p10, %s32_s25), 0  ;;  %s1473_s4 = sand.u32 1, %s1350_s14  }
  0x1e   : > { %s1009_s5 = sshll.u32 %s1358_s16, 8  ;;  %s44_s6 = ssub.s32 %s1358_s16, %s1655_s25 }
  0x1f   : > { %p46_p0 = scmp.eq.s32.totalorder %s44_s6, 0  ;;  %s923_s7 = sshll.u32 %s1473_s4, 4 }
  0x20   : > { %s193_s10 = scalar_lea.hbm %s1632_s0, %s1009_s5  ;;  %s185_s12 = scalar_lea.vmem [#allocation3], %s923_s7 }
  0x21   : > { %s1485_s11 = scalar_select %p46_p0, %s1350_s14, %s48_s19  }
  0x22   : > { %s195_s22 = sshll.u32 %s185_s12, 4  ;;  %p1491_p2 = pnand %p1037_p12, %p1456_p11  ;;  %s196_s22 = int_to_ptr.vmem [resolvable:$true] %s195_s22 }
  0x23   : > { %s926_s24 = sshll.u32 %s1473_s4, 9  ;;  %s182_s26 = scalar_lea.sflag [#allocation4], %s1473_s4 }
  0x24   : > { %p1222_p5 = pneg %p1491_p2  ;;  %s1233_s28 = scalar_lea.vmem %s196_s22, 256 }
  0x25   : > { %p1234_p6 = scmp.ne.s32.totalorder %s196_s22, %s1233_s28  ;;  %s1365_s19 = smov [#allocation3]  }
  0x26   : > { %s1238_s27 = sshll.u32 %s1365_s19, 4  ;;  %s1239_s27 = int_to_ptr.vmem [resolvable:$false] %s1238_s27 }
  0x27   : > { %p1236_p8 = pnand %p1234_p6, %p1222_p5  ;;  %s1240_s29 = scalar_lea.vmem %s1239_s27, 512 }
  0x28   : > { %p1241_p10 = scmp.lt.s32.totalorder %s196_s22, %s1239_s27  ;;  %p1242_p11 = scmp.lt.s32.totalorder %s1240_s29, %s1233_s28 }
  0x29   : > { %p1237_p9 = pneg %p1236_p8 }
  0x2a   : > { %p1243_p12 = por %p1242_p11, %p1241_p10 }
  0x2c   : > { %p1244_p13 = pnand %p1243_p12, %p1237_p9 }
  0x2e   : > { %1247 = shalt.err (!%p1244_p13)
}
  0x2f   : > { %1032 = dma.hbm_to_vmem [thread:$0]  (!%p1491_p2), %s193_s10, 256, %s196_s22, %s182_s26  }
  0x30   : > { %s1011_s30 = sshll.u32 %s1358_s16, 13  ;;  %s206_s4 = scalar_lea.vmem [#allocation6], %s926_s24 }
  0x31   : > { %s216_s5 = sshll.u32 %s206_s4, 4  ;;  %s202_s6 = sand.u32 1, %s1362_s17   ;;  %s217_s5 = int_to_ptr.vmem [resolvable:$true] %s216_s5 }
  0x32   : > { %s215_s9 = scalar_lea.hbm %s1633_s1, %s1011_s30  ;;  %s203_s12 = scalar_lea.sflag [#allocation7], %s202_s6 }
  0x33   : > { %s1261_s28 = scalar_lea.vmem %s217_s5, 8192  ;;  %s1366_s19 = smov [#allocation6]  }
  0x34   : > { %p1262_p1 = scmp.ne.s32.totalorder %s217_s5, %s1261_s28  ;;  %s1266_s27 = sshll.u32 %s1366_s19, 4  ;;  %s1267_s27 = int_to_ptr.vmem [resolvable:$false] %s1266_s27 }
  0x35   : > { %s1268_s10 = scalar_lea.vmem %s1267_s27, 16384  ;;  %p1269_p7 = scmp.lt.s32.totalorder %s217_s5, %s1267_s27 }
  0x36   : > { %p1264_p3 = pnand %p1262_p1, %p1222_p5  ;;  %p1270_p0 = scmp.lt.s32.totalorder %s1268_s10, %s1261_s28 }
  0x38   : > { %p1265_p4 = pneg %p1264_p3  ;;  %p1271_p6 = por %p1270_p0, %p1269_p7 }
  0x3a   : > { %p1272_p8 = pnand %p1271_p6, %p1265_p4 }
  0x3c   : > { %1275 = shalt.err (!%p1272_p8)
}
  0x3d   : > { %s1367_s22 = smov 128   ;;  %s1368_s24 = smov 8  }
  0x3e   : > { %1035 = dma.hbm_to_vmem [thread:$0]  (!%p1491_p2), %s215_s9, 8192, %s217_s5, %s203_s12, %s1367_s22, %s1367_s22, %s1368_s24  }
  0x3f   : > { %p1645_p9 = scmp.ne.s32.totalorder %s1640_s21, 0 }
  0x40   : > { %s230_s26 = sand.u32 (!%p1645_p9), 1, %s1346_s13   ;;  %p1646_p5 = scmp.ne.s32.totalorder (!%p1645_p9), %s1639_s20, 0 }
  0x41   : > { %228 = sbr.rel (%p1645_p9) target bundleno = 382 (0x17e), region = 32  ;;  %s931_s29 = sshll.u32 (!%p1645_p9), %s230_s26, 4 }
  0x42   : > { %s231_s30 = scalar_lea.sflag (!%p1645_p9), [#allocation4], %s230_s26  ;;  %s1517_s4 = scalar_lea.vmem (!%p1645_p9), [#allocation3], %s931_s29 }
  0x46   : > { %1325 = dma.done.wait (%p1646_p5), %s231_s30, 256  }
  0x47   : > { %1327 = vsyncadd (%p1646_p5), %s231_s30, 4294967040  ;;  %s239_s6 = sand.u32 1, %s1420_s18   ;;  %s932_s23 = sshll.u32 %s230_s26, 9 }
  0x48   : > { %s240_s5 = scalar_lea.sflag [#allocation7], %s239_s6  ;;  %s1524_s7 = scalar_lea.vmem [#allocation6], %s932_s23 }
  0x49   : > { %1329 = dma.done.wait (%p1646_p5), %s240_s5, 8192  }
  0x4a   : > { %1331 = vsyncadd (%p1646_p5), %s240_s5, 4294959104  ;;  %p1647_p2 = scmp.eq.s32.totalorder %s1420_s18, 0 }
  0x4c   : > { %1333 = dma.done.wait (%p1647_p2), [#allocation7], 32   ;;  %p1648_p10 = pmov %p1647_p2 }
  0x4d   : > { %p934_p11 = scmp.ne.s32.totalorder %s1354_s15, 0 }
  0x4e   : > { %1335 = vsyncadd (%p1648_p10), [#allocation7], 4294967264 }
  0x4f   : > { %278 = sbr.rel (%p934_p11) target bundleno = 86 (0x56), region = 48 }
  0x54   : > { %v1369_v0 = vmov 0.0  }
  0x55   : > { %279 = vst [vmem:[#allocation2] sm:$0xff] %v1369_v0  ;;  %280 = vst [vmem:[#allocation2 + $0x8] sm:$0xff] %v1369_v0 }
  0x56 PF: > { %v1094_v1 = vld [vmem:[%s1524_s7 + $0x74] ss:$8 sps:$4 sm:$0xff]   ;;  %v1098_v3 = vld [vmem:[%s1524_s7 + $0x70] ss:$8 sps:$4 sm:$0xff]   ;;  %v1100_v5 = vld [vmem:[%s1524_s7 + $0x64] ss:$8 sps:$4 sm:$0xff]  }
  0x57   : > { %v1096_v2 = vld [vmem:[%s1524_s7 + $0x174] ss:$8 sps:$4 sm:$0xff]   ;;  %683 = vmatprep.subr.bf16.mxu0 %v1094_v1  ;;  %v1099_v4 = vld [vmem:[%s1524_s7 + $0x170] ss:$8 sps:$4 sm:$0xff]   ;;  %v1102_v6 = vld [vmem:[%s1524_s7 + $0x164] ss:$8 sps:$4 sm:$0xff]  }
  0x58   : > { %724 = vmatprep.subr.bf16.mxu1 %v1096_v2  ;;  %684 = vmatpush1.bf16.msra.mxu0 %v1098_v3  ;;  %v1104_v7 = vld [vmem:[%s1524_s7 + $0x60] ss:$8 sps:$4 sm:$0xff]   ;;  %v1106_v9 = vld [vmem:[%s1524_s7 + $0x54] ss:$8 sps:$4 sm:$0xff]   ;;  %v1110_v11 = vld [vmem:[%s1524_s7 + $0x50] ss:$8 sps:$4 sm:$0xff]  }
  0x59   : > { %725 = vmatpush1.bf16.msra.mxu1 %v1099_v4  ;;  %685 = vmatprep.subr.bf16.mxu0 %v1100_v5  ;;  %v1105_v8 = vld [vmem:[%s1524_s7 + $0x160] ss:$8 sps:$4 sm:$0xff]   ;;  %v1108_v10 = vld [vmem:[%s1524_s7 + $0x154] ss:$8 sps:$4 sm:$0xff]   ;;  %v1111_v12 = vld [vmem:[%s1524_s7 + $0x150] ss:$8 sps:$4 sm:$0xff]  }
  0x5a   : > { %726 = vmatprep.subr.bf16.mxu1 %v1102_v6  ;;  %v1112_v13 = vld [vmem:[%s1524_s7 + $0x44] ss:$8 sps:$4 sm:$0xff]   ;;  %v1116_v15 = vld [vmem:[%s1524_s7 + $0x40] ss:$8 sps:$4 sm:$0xff]   ;;  %v1118_v17 = vld [vmem:[%s1524_s7 + $0x34] ss:$8 sps:$4 sm:$0xff]  }
  0x5b   : > { %v1114_v14 = vld [vmem:[%s1524_s7 + $0x144] ss:$8 sps:$4 sm:$0xff]   ;;  %v1117_v16 = vld [vmem:[%s1524_s7 + $0x140] ss:$8 sps:$4 sm:$0xff]   ;;  %v1120_v18 = vld [vmem:[%s1524_s7 + $0x134] ss:$8 sps:$4 sm:$0xff]  }
  0x5c   : > { %686 = vmatpush1.bf16.msra.mxu0 %v1104_v7  ;;  %v1122_v19 = vld [vmem:[%s1524_s7 + $0x30] ss:$8 sps:$4 sm:$0xff]   ;;  %v1124_v21 = vld [vmem:[%s1524_s7 + $0x24] ss:$8 sps:$4 sm:$0xff]   ;;  %v1128_v23 = vld [vmem:[%s1524_s7 + $0x20] ss:$8 sps:$4 sm:$0xff]  }
  0x5d   : > { %727 = vmatpush1.bf16.msra.mxu1 %v1105_v8  ;;  %687 = vmatprep.subr.bf16.mxu0 %v1106_v9  ;;  %v1123_v20 = vld [vmem:[%s1524_s7 + $0x130] ss:$8 sps:$4 sm:$0xff]   ;;  %v1126_v22 = vld [vmem:[%s1524_s7 + $0x124] ss:$8 sps:$4 sm:$0xff]   ;;  %v1129_v24 = vld [vmem:[%s1524_s7 + $0x120] ss:$8 sps:$4 sm:$0xff]  }
  0x5e   : > { %728 = vmatprep.subr.bf16.mxu1 %v1108_v10  ;;  %v1130_v25 = vld [vmem:[%s1524_s7 + $0x14] ss:$8 sps:$4 sm:$0xff]   ;;  %v1134_v27 = vld [vmem:[%s1524_s7 + $0x10] ss:$8 sps:$4 sm:$0xff]   ;;  %v1136_v29 = vld [vmem:[%s1524_s7 + $0x4] ss:$8 sps:$4 sm:$0xff]  }
  0x5f   : > { %v1132_v26 = vld [vmem:[%s1524_s7 + $0x114] ss:$8 sps:$4 sm:$0xff]   ;;  %v1135_v28 = vld [vmem:[%s1524_s7 + $0x110] ss:$8 sps:$4 sm:$0xff]   ;;  %v1138_v30 = vld [vmem:[%s1524_s7 + $0x104] ss:$8 sps:$4 sm:$0xff]  }
  0x60   : > { %688 = vmatpush1.bf16.msra.mxu0 %v1110_v11  ;;  %v1140_v31 = vld [vmem:[%s1524_s7] ss:$8 sps:$4 sm:$0xff]   ;;  %v1142_v33 = vld [vmem:[%s1524_s7 + $0xf4] ss:$8 sps:$4 sm:$0xff]   ;;  %v1146_v35 = vld [vmem:[%s1524_s7 + $0xf0] ss:$8 sps:$4 sm:$0xff]  }
  0x61   : > { %729 = vmatpush1.bf16.msra.mxu1 %v1111_v12  ;;  %689 = vmatprep.subr.bf16.mxu0 %v1112_v13  ;;  %v1141_v32 = vld [vmem:[%s1524_s7 + $0x100] ss:$8 sps:$4 sm:$0xff]   ;;  %v1144_v34 = vld [vmem:[%s1524_s7 + $0x1f4] ss:$8 sps:$4 sm:$0xff]   ;;  %v1147_v36 = vld [vmem:[%s1524_s7 + $0x1f0] ss:$8 sps:$4 sm:$0xff]  }
  0x62   : > { %730 = vmatprep.subr.bf16.mxu1 %v1114_v14  ;;  %v1148_v37 = vld [vmem:[%s1524_s7 + $0xe4] ss:$8 sps:$4 sm:$0xff]   ;;  %v1152_v39 = vld [vmem:[%s1524_s7 + $0xe0] ss:$8 sps:$4 sm:$0xff]   ;;  %v1154_v41 = vld [vmem:[%s1524_s7 + $0xd4] ss:$8 sps:$4 sm:$0xff]  }
  0x63   : > { %v1150_v38 = vld [vmem:[%s1524_s7 + $0x1e4] ss:$8 sps:$4 sm:$0xff]   ;;  %v1153_v40 = vld [vmem:[%s1524_s7 + $0x1e0] ss:$8 sps:$4 sm:$0xff]   ;;  %v1156_v42 = vld [vmem:[%s1524_s7 + $0x1d4] ss:$8 sps:$4 sm:$0xff]  }
  0x64   : > { %690 = vmatpush1.bf16.msra.mxu0 %v1116_v15  ;;  %v1158_v43 = vld [vmem:[%s1524_s7 + $0xd0] ss:$8 sps:$4 sm:$0xff]   ;;  %v1160_v45 = vld [vmem:[%s1524_s7 + $0xc4] ss:$8 sps:$4 sm:$0xff]   ;;  %v1164_v50 = vld [vmem:[%s1524_s7 + $0xc0] ss:$8 sps:$4 sm:$0xff]  }
  0x65   : > { %731 = vmatpush1.bf16.msra.mxu1 %v1117_v16  ;;  %691 = vmatprep.subr.bf16.mxu0 %v1118_v17  ;;  %v1159_v44 = vld [vmem:[%s1524_s7 + $0x1d0] ss:$8 sps:$4 sm:$0xff]   ;;  %v1162_v46 = vld [vmem:[%s1524_s7 + $0x1c4] ss:$8 sps:$4 sm:$0xff]   ;;  %v1165_v51 = vld [vmem:[%s1524_s7 + $0x1c0] ss:$8 sps:$4 sm:$0xff]  }
  0x66   : > { %732 = vmatprep.subr.bf16.mxu1 %v1120_v18  ;;  %v283_v47 = vld [vmem:[%s1517_s4] sm:$0xff]  ;;  %v284_v49 = vld [vmem:[%s1517_s4 + $0x8] sm:$0xff]  ;;  %p1003_p12 = scmp.ne.s32.totalorder %s1354_s15, 5 }
  0x67   : > { %v936_v48 = vcombine.high %v283_v47, %v283_v47  ;;  %v938_v52 = vcombine.high %v284_v49, %v284_v49  ;;  %v1166_v53 = vld [vmem:[%s1524_s7 + $0xb4] ss:$8 sps:$4 sm:$0xff]   ;;  %v1170_v55 = vld [vmem:[%s1524_s7 + $0xb0] ss:$8 sps:$4 sm:$0xff]   ;;  %v1172_v57 = vld [vmem:[%s1524_s7 + $0xa4] ss:$8 sps:$4 sm:$0xff]   ;;  %v935_v5 = vcombine.low %v283_v47, %v283_v47  ;;  %v937_v6 = vcombine.low %v284_v49, %v284_v49 }
  0x68   : > { %692 = vmatpush1.bf16.msra.mxu0 %v1122_v19  ;;  %v1168_v54 = vld [vmem:[%s1524_s7 + $0x1b4] ss:$8 sps:$4 sm:$0xff]   ;;  %v1171_v56 = vld [vmem:[%s1524_s7 + $0x1b0] ss:$8 sps:$4 sm:$0xff]   ;;  %v1174_v58 = vld [vmem:[%s1524_s7 + $0x1a4] ss:$8 sps:$4 sm:$0xff]  }
  0x69   : > { %733 = vmatpush1.bf16.msra.mxu1 %v1123_v20  ;;  %693 = vmatprep.subr.bf16.mxu0 %v1124_v21  ;;  %v1176_v59 = vld [vmem:[%s1524_s7 + $0xa0] ss:$8 sps:$4 sm:$0xff]   ;;  %v1178_v61 = vld [vmem:[%s1524_s7 + $0x94] ss:$8 sps:$4 sm:$0xff]   ;;  %v1182_v63 = vld [vmem:[%s1524_s7 + $0x90] ss:$8 sps:$4 sm:$0xff]  }
  0x6a   : > { %734 = vmatprep.subr.bf16.mxu1 %v1126_v22  ;;  %715 = vmatprep.mubr.bf16.mxu0 %v936_v48  ;;  %v1177_v60 = vld [vmem:[%s1524_s7 + $0x1a0] ss:$8 sps:$4 sm:$0xff]   ;;  %v1180_v62 = vld [vmem:[%s1524_s7 + $0x194] ss:$8 sps:$4 sm:$0xff]   ;;  %v1183_v0 = vld [vmem:[%s1524_s7 + $0x190] ss:$8 sps:$4 sm:$0xff]  }
  0x6b   : > { %756 = vmatprep.mubr.bf16.mxu1 %v938_v52  ;;  %v1184_v1 = vld [vmem:[%s1524_s7 + $0x84] ss:$8 sps:$4 sm:$0xff]   ;;  %v1188_v3 = vld [vmem:[%s1524_s7 + $0x80] ss:$8 sps:$4 sm:$0xff]   ;;  %v281_v8 = vld [vmem:[#allocation2] sm:$0xff] }
  0x6c   : > { %694 = vmatpush1.bf16.msra.mxu0 %v1128_v23  ;;  %v1186_v2 = vld [vmem:[%s1524_s7 + $0x184] ss:$8 sps:$4 sm:$0xff]   ;;  %v1189_v4 = vld [vmem:[%s1524_s7 + $0x180] ss:$8 sps:$4 sm:$0xff]   ;;  %v282_v12 = vld [vmem:[#allocation2 + $0x8] sm:$0xff] }
  0x6d   : > { %735 = vmatpush1.bf16.msra.mxu1 %v1129_v24  ;;  %695 = vmatprep.subr.bf16.mxu0 %v1130_v25 }
  0x6e   : > { %736 = vmatprep.subr.bf16.mxu1 %v1132_v26 }
  0x70   : > { %696 = vmatpush1.bf16.msra.mxu0 %v1134_v27 }
  0x71   : > { %737 = vmatpush1.bf16.msra.mxu1 %v1135_v28  ;;  %697 = vmatprep.subr.bf16.mxu0 %v1136_v29 }
  0x72   : > { %738 = vmatprep.subr.bf16.mxu1 %v1138_v30 }
  0x74   : > { %698 = vmatpush1.bf16.msra.mxu0 %v1140_v31 }
  0x75   : > { %739 = vmatpush1.bf16.msra.mxu1 %v1141_v32  ;;  %699 = vmatprep.subr.bf16.mxu0 %v1142_v33 }
  0x76   : > { %740 = vmatprep.subr.bf16.mxu1 %v1144_v34 }
  0x78   : > { %700 = vmatpush2.bf16.msra.mxu0 %v1146_v35 }
  0x79   : > { %741 = vmatpush2.bf16.msra.mxu1 %v1147_v36  ;;  %701 = vmatprep.subr.bf16.mxu0 %v1148_v37 }
  0x7a   : > { %742 = vmatprep.subr.bf16.mxu1 %v1150_v38 }
  0x7c   : > { %702 = vmatpush2.bf16.msra.mxu0 %v1152_v39 }
  0x7d   : > { %743 = vmatpush2.bf16.msra.mxu1 %v1153_v40  ;;  %703 = vmatprep.subr.bf16.mxu0 %v1154_v41 }
  0x7e   : > { %744 = vmatprep.subr.bf16.mxu1 %v1156_v42 }
  0x80   : > { %704 = vmatpush2.bf16.msra.mxu0 %v1158_v43 }
  0x81   : > { %745 = vmatpush2.bf16.msra.mxu1 %v1159_v44  ;;  %705 = vmatprep.subr.bf16.mxu0 %v1160_v45 }
  0x82   : > { %746 = vmatprep.subr.bf16.mxu1 %v1162_v46 }
  0x84   : > { %706 = vmatpush2.bf16.msra.mxu0 %v1164_v50 }
  0x85   : > { %747 = vmatpush2.bf16.msra.mxu1 %v1165_v51  ;;  %707 = vmatprep.subr.bf16.mxu0 %v1166_v53 }
  0x86   : > { %748 = vmatprep.subr.bf16.mxu1 %v1168_v54 }
  0x88   : > { %708 = vmatpush2.bf16.msra.mxu0 %v1170_v55 }
  0x89   : > { %749 = vmatpush2.bf16.msra.mxu1 %v1171_v56  ;;  %709 = vmatprep.subr.bf16.mxu0 %v1172_v57 }
  0x8a   : > { %750 = vmatprep.subr.bf16.mxu1 %v1174_v58 }
  0x8c   : > { %710 = vmatpush2.bf16.msra.mxu0 %v1176_v59 }
  0x8d   : > { %751 = vmatpush2.bf16.msra.mxu1 %v1177_v60  ;;  %711 = vmatprep.subr.bf16.mxu0 %v1178_v61 }
  0x8e   : > { %752 = vmatprep.subr.bf16.mxu1 %v1180_v62 }
  0x90   : > { %712 = vmatpush2.bf16.msra.mxu0 %v1182_v63 }
  0x91   : > { %753 = vmatpush2.bf16.msra.mxu1 %v1183_v0  ;;  %713 = vmatprep.subr.bf16.mxu0 %v1184_v1 }
  0x92   : > { %754 = vmatprep.subr.bf16.mxu1 %v1186_v2 }
  0x94   : > { %714 = vmatpush2.bf16.msra.mxu0 %v1188_v3 }
  0x95   : > { %755 = vmatpush2.bf16.msra.mxu1 %v1189_v4 }
  0x97   : > { %716 = vmatmul.mubr.bf16.vlgmr.msra.gmra.mxu0 %v935_v5 }
  0x98   : > { %757 = vmatmul.mubr.bf16.vlgmr.msra.gmra.mxu1 %v937_v6 }
 0x157   : > { %v717_v7 = vpop.f32.mrf.mxu0 }
 0x158   : > { %v758_v9 = vpop.f32.mrf.mxu1 }
 0x159   : > { %v759_v10 = vadd.f32 %v758_v9, %v717_v7  ;;  %v719_v11 = vpop.f32.mrf.mxu0 }
 0x15a   : > { %v760_v13 = vpop.f32.mrf.mxu1 }
 0x15b   : > { %v765_v14 = vadd.f32 %v759_v10, %v281_v8  ;;  %v761_v15 = vadd.f32 %v760_v13, %v719_v11  ;;  %v721_v16 = vpop.f32.mrf.mxu0  ;;  %772 = sbr.rel (%p1003_p12) target bundleno = 367 (0x16f), region = 52 }
 0x15c   : > { %v762_v17 = vpop.f32.mrf.mxu1 }
 0x15d   : > { %767 = vst [vmem:[#allocation2] sm:$0xff] %v765_v14  ;;  %v766_v18 = vadd.f32 %v761_v15, %v282_v12  ;;  %v722_v19 = vpop.f32.mrf.mxu0 }
 0x15e   : > { %v763_v20 = vpop.f32.mrf.mxu1 }
 0x15f   : > { %768 = vst [vmem:[#allocation2 + $0x8] sm:$0xff] %v766_v18 }
 0x160   : > { %v777_v21 = vlaneseq  ;;  %v775_v23 = vld [vmem:[#allocation8] sm:$0x3] }
 0x162   : > { %v778_v22 = vshrl.u32 %v777_v21, 7 }
 0x164   : > { %v779_v24 = vsub.s32 0, %v778_v22  ;;  %v783_v25 = vsub.s32 1, %v778_v22  ;;  %v773_v26 = vld [vmem:[#allocation2] sm:$0xff] }
 0x166   : > { %v774_v27 = vld [vmem:[#allocation2 + $0x8] sm:$0xff]  ;;  %v780_v28 = vrot.slane %v775_v23, %v779_v24  ;;  %v784_v29 = vrot.slane %v775_v23, %v783_v25 }
 0x168   : > { %v787_v30 = vadd.f32 %v780_v28, %v773_v26  ;;  %v788_v31 = vadd.f32 %v784_v29, %v774_v27 }
 0x16a   : > { %v789_v32 = vmax.f32 %v787_v30, 0.0  ;;  %v790_v33 = vmax.f32 %v788_v31, 0.0 }
 0x16c   : > { %v1012_v34 = vpack.c.bf16 %v790_v33, %v789_v32 }
 0x16e   : > { %799 = vst [vmem:[#allocation9] sm:$0xff] %v1012_v34 }
 0x16f PF: > { %p1039_p13 = scmp.eq.s32.totalorder %s1420_s18, 5  ;;  %s1370_s15 = smov [#allocation9]  }
 0x170   : > { %s812_s20 = sshll.u32 %s1370_s15, 4  ;;  %s813_s20 = int_to_ptr.vmem [resolvable:$true] %s812_s20 }
 0x171   : > { %s1276_s21 = scalar_lea.vmem %s813_s20, 128  ;;  %p1283_p7 = scmp.lt.s32.totalorder %s813_s20, %s813_s20 }
 0x172   : > { %p1277_p1 = scmp.ne.s32.totalorder %s813_s20, %s1276_s21  ;;  %p1284_p0 = scmp.lt.s32.totalorder %s1276_s21, %s1276_s21 }
 0x174   : > { %p1278_p3 = pnand %p1277_p1, %p1039_p13  ;;  %p1285_p6 = por %p1284_p0, %p1283_p7 }
 0x176   : > { %p1279_p4 = pneg %p1278_p3 }
 0x178   : > { %p1286_p8 = pnand %p1285_p6, %p1279_p4 }
 0x17a   : > { %1289 = shalt.err (!%p1286_p8)
}
 0x17b   : > { %1022 = dma.vmem_to_hbm [thread:$0]  (%p1039_p13), %s813_s20, 128, %s1635_s3, [#allocation5]  }
 0x17c   : > { %1337 = dma.done.wait (%p1039_p13), [#allocation5], 128  }
 0x17d   : > { %1339 = vsyncadd (%p1039_p13), [#allocation5], 4294967168 }
 0x17e PF: > { %s20_s17 = sadd.s32 1, %s1362_s17   ;;  %s1649_s12 = smov %s1346_s13 }
 0x17f   : > { %p17_p9 = scmp.ge.s32.totalorder %s20_s17, 8   ;;  %s1650_s13 = smov %s1350_s14 }
 0x180   : > { %s1651_s14 = smov %s1485_s11  ;;  %s1652_s15 = smov %s1358_s16 }
 0x181   : > { %s1653_s16 = smov %s1655_s25  ;;  %19 = sbr.rel (!%p17_p9) target bundleno = 7 (0x7), region = 96 }
 0x186   :  { %825 = vsyncpa [#allocation4], 1 }
 0x187   :  { %827 = vsyncpa [#allocation4 + $0x1], 1 }
 0x188   :  { %828 = vsyncpa [#allocation7], 1 }
 0x189   :  { %830 = vsyncpa [#allocation7 + $0x1], 1 }
 0x18a   :  { %831 = vsyncpa [#allocation5], 1 }
 0x18b   :  { %833 = vsyncpa [#allocation5 + $0x1], 1 }

</bundles_post_ra>
